<compile_context>
chip_gen: v7x
topology: tpu7x:2x2x1
jax: 0.10.0
libtpu: 0.0.40
codegen_flags: <defaults>
</compile_context>

<pallas_src>
import functools

import jax
import jax.numpy as jnp
from jax.experimental import pallas as pl
from jax.experimental.pallas import tpu as pltpu

_LANE = 128
_SUBLANE = 8
_DEFAULT_VMEM_BUDGET = 24 * 1024 * 1024   # tiling budget; safe on v5e/v6e/v7x


def _round_up(x, n):
    return ((x + n - 1) // n) * n


# ---------------------------------------------------------------------------
# Kernels
# ---------------------------------------------------------------------------
def _linear_bias_kernel(x_ref, w_ref, b_ref, o_ref):
    """Single-K-step path: o = x @ W + b with f32 MXU accumulation."""
    acc = jnp.dot(x_ref[...], w_ref[...], preferred_element_type=jnp.float32)
    o_ref[...] = (acc + b_ref[...]).astype(o_ref.dtype)


def _linear_bias_acc_kernel(x_ref, w_ref, b_ref, o_ref, acc_ref):
    """K-tiled path: accumulate partial products in f32 scratch; finalize at
    the last K step (reduction axis is last and marked 'arbitrary')."""
    k = pl.program_id(2)

    @pl.when(k == 0)
    def _init():
        acc_ref[...] = jnp.zeros_like(acc_ref)

    acc_ref[...] += jnp.dot(x_ref[...], w_ref[...],
                            preferred_element_type=jnp.float32)

    @pl.when(k == pl.num_programs(2) - 1)
    def _finalize():
        o_ref[...] = (acc_ref[...] + b_ref[...]).astype(o_ref.dtype)


# ---------------------------------------------------------------------------
# Tiling heuristics
# ---------------------------------------------------------------------------
def _choose_tiles(m, h_in, h_out, x_bytes, w_bytes, o_bytes, budget):
    # K / N tiles: keep W as one resident block when it comfortably fits
    # (counting the 2x double-buffering Pallas allocates even for a constant
    # block index); otherwise tile N (partial last block is safe — writes are
    # masked) and tile K only with an even 128-multiple divisor (a ragged K
    # tail would feed undefined data into the reduction).
    w_budget = budget // 2
    if 2 * h_in * h_out * w_bytes <= w_budget:
        tile_k, tile_n = h_in, h_out
    else:
        tile_n = h_out if h_out <= 512 else 512
        tile_k = h_in
        if 2 * h_in * tile_n * w_bytes > w_budget and h_in > _LANE:
            cand = (min(512, h_in - _LANE) // _LANE) * _LANE
            while cand >= _LANE:
                if h_in % cand == 0:
                    tile_k = cand
                    break
                cand -= _LANE
            # TODO(synk): huge h_in with no 128-multiple divisor keeps K
            #             un-tiled; would need in-kernel masking of the tail.

    grid_k = pl.cdiv(h_in, tile_k)

    # M tile from the remaining budget; x / out are double-buffered, the f32
    # accumulator scratch is single-buffered and only present when K is tiled.
    fixed = 2 * (tile_k * tile_n * w_bytes + tile_n * 4)
    per_row = 2 * tile_k * x_bytes + 2 * tile_n * o_bytes
    if grid_k > 1:
        per_row += tile_n * 4

    # Sublane granularity for the M dimension (packed sublanes for <32-bit).
    sub = _SUBLANE * max(1, 4 // min(x_bytes, o_bytes))

    avail = budget - fixed
    if avail < per_row * sub:
        tile_m = sub
    else:
        tile_m = (avail // per_row) // sub * sub
    tile_m = max(sub, min(tile_m, 2048))
    if tile_m >= m:
        tile_m = m                       # single full-extent block (always legal)

    # v7x has 2 TensorCores: give the "parallel" M axis >= 2 steps when there
    # is enough work to split.
    if m >= 2 * sub:
        while tile_m > sub and pl.cdiv(m, tile_m) < 2:
            tile_m = _round_up(max(sub, tile_m // 2), sub)

    return tile_m, tile_n, tile_k, grid_k


# ---------------------------------------------------------------------------
# Wrappers
# ---------------------------------------------------------------------------
def prepare_msg_encoder_params(weight, bias, *, compute_dtype=None):
    """One-time conversion of PyTorch nn.Linear params: [out, in] -> [in, out]
    plus optional cast. Do this ONCE and reuse across forward calls so the
    transpose / cast are not re-run (an un-hidden extra HBM pass) every step."""
    w = weight.T
    if compute_dtype is not None:
        w = w.astype(compute_dtype)
    return w, bias.astype(jnp.float32)


def ic3net_msg_encoder(hidden_features, weight, bias, *,
                       compute_dtype=None, out_dtype=None,
                       weight_is_transposed=False,
                       vmem_budget_bytes=_DEFAULT_VMEM_BUDGET):
    """IC3Net message encoder: Linear(hid -> hid) over hidden_features.

    hidden_features: [..., hid_size]
    weight:          [out, in] (PyTorch nn.Linear layout), or [in, out] if
                     weight_is_transposed=True (e.g. prepare_msg_encoder_params).
    bias:            [out]
    compute_dtype:   optional MXU input dtype (e.g. jnp.bfloat16); accumulation
                     and the bias add stay float32.
    out_dtype:       optional output dtype (e.g. jnp.bfloat16 halves writeback
                     traffic); defaults to the input dtype.
    """
    orig_shape = hidden_features.shape
    h_in = orig_shape[-1]
    if weight_is_transposed:
        w = weight
        assert w.shape[0] == h_in, "transposed weight must be [in, out]"
        h_out = w.shape[1]
    else:
        h_out = weight.shape[0]
        assert weight.shape == (h_out, h_in), "weight must be [out, in]"
        w = weight.T

    if out_dtype is None:
        out_dtype = hidden_features.dtype

    x = hidden_features.reshape(-1, h_in)
    m = x.shape[0]

    if compute_dtype is not None:
        # NOTE: prefer producing compute_dtype activations upstream and
        # pre-casting W (prepare_msg_encoder_params); a standalone cast here
        # is an extra HBM pass when XLA does not fuse it.
        x = x.astype(compute_dtype)
        w = w.astype(compute_dtype)
    b = bias.astype(jnp.float32).reshape(1, h_out)

    x_bytes = jnp.dtype(x.dtype).itemsize
    w_bytes = jnp.dtype(w.dtype).itemsize
    o_bytes = jnp.dtype(out_dtype).itemsize

    tile_m, tile_n, tile_k, grid_k = _choose_tiles(
        m, h_in, h_out, x_bytes, w_bytes, o_bytes, vmem_budget_bytes)

    grid = (pl.cdiv(m, tile_m), pl.cdiv(h_out, tile_n), grid_k)

    in_specs = [
        pl.BlockSpec((tile_m, tile_k), lambda i, j, k: (i, k)),   # x tile
        pl.BlockSpec((tile_k, tile_n), lambda i, j, k: (k, j)),   # W tile
        pl.BlockSpec((1, tile_n), lambda i, j, k: (0, j)),        # bias tile
    ]
    out_spec = pl.BlockSpec((tile_m, tile_n), lambda i, j, k: (i, j))

    if grid_k == 1:
        kernel = _linear_bias_kernel
        scratch_shapes = []
    else:
        kernel = _linear_bias_acc_kernel
        scratch_shapes = [pltpu.VMEM((tile_m, tile_n), jnp.float32)]

    cost = pl.CostEstimate(
        flops=2 * m * h_in * h_out,
        transcendentals=0,
        bytes_accessed=(m * h_in * x_bytes + h_in * h_out * w_bytes
                        + h_out * 4 + m * h_out * o_bytes),
    )

    out = pl.pallas_call(
        kernel,
        out_shape=jax.ShapeDtypeStruct((m, h_out), out_dtype),
        grid_spec=pltpu.PrefetchScalarGridSpec(
            num_scalar_prefetch=0,
            grid=grid,
            in_specs=in_specs,
            out_specs=out_spec,
            scratch_shapes=scratch_shapes,
        ),
        compiler_params=pltpu.CompilerParams(
            dimension_semantics=("parallel", "parallel", "arbitrary"),
            vmem_limit_bytes=int(vmem_budget_bytes + 8 * 1024 * 1024),
        ),
        cost_estimate=cost,
    )(x, w, b)

    return out.reshape(*orig_shape[:-1], h_out)


if __name__ == "__main__":
    # --- 1. Module-scale shapes: batch=2, n_agents=4, hid_size=32 -----------
    batch, n_agents, hid_size = 2, 4, 32
    key = jax.random.PRNGKey(0)
    k_x, k_w, k_b, k_x2, k_w2, k_b2 = jax.random.split(key, 6)

    hidden_features = jax.random.normal(
        k_x, (batch, n_agents, hid_size), dtype=jnp.float32)
    bound = 1.0 / float(hid_size) ** 0.5
    # PyTorch nn.Linear layout: [out_features, in_features]
    weight = jax.random.uniform(
        k_w, (hid_size, hid_size), minval=-bound, maxval=bound,
        dtype=jnp.float32)
    bias = jax.random.uniform(
        k_b, (hid_size,), minval=-bound, maxval=bound, dtype=jnp.float32)

    fwd = jax.jit(ic3net_msg_encoder)
    out = jax.block_until_ready(fwd(hidden_features, weight, bias))
    ref = (hidden_features.reshape(-1, hid_size) @ weight.T + bias
           ).reshape(batch, n_agents, hid_size)
    assert out.shape == (batch, n_agents, hid_size)
    assert jnp.allclose(out, ref, atol=1e-5, rtol=1e-5)

    # --- 2. bf16 compute + bf16 output with pre-prepared (cached) weight ----
    w_t, b_f32 = prepare_msg_encoder_params(weight, bias,
                                            compute_dtype=jnp.bfloat16)
    fwd_bf16 = jax.jit(functools.partial(
        ic3net_msg_encoder, compute_dtype=jnp.bfloat16,
        out_dtype=jnp.bfloat16, weight_is_transposed=True))
    out_bf16 = jax.block_until_ready(fwd_bf16(hidden_features, w_t, b_f32))
    x_bf = hidden_features.reshape(-1, hid_size).astype(jnp.bfloat16)
    ref_bf = (x_bf.astype(jnp.float32) @ w_t.astype(jnp.float32) + b_f32
              ).reshape(batch, n_agents, hid_size)
    assert out_bf16.dtype == jnp.bfloat16
    assert jnp.allclose(out_bf16.astype(jnp.float32), ref_bf,
                        atol=3e-2, rtol=3e-2)

    # --- 3. Ragged M + forced K/N tiling (accumulator path, tiny budget) ----
    m3, h3 = 125, 384
    x3 = jax.random.normal(k_x2, (m3, h3), dtype=jnp.float32)
    w3 = jax.random.uniform(k_w2, (h3, h3), minval=-0.05, maxval=0.05,
                            dtype=jnp.float32)
    b3 = jax.random.uniform(k_b2, (h3,), minval=-0.05, maxval=0.05,
                            dtype=jnp.float32)
    fwd_tiled = jax.jit(functools.partial(
        ic3net_msg_encoder, vmem_budget_bytes=1 * 1024 * 1024))
    out3 = jax.block_until_ready(fwd_tiled(x3, w3, b3))
    ref3 = x3 @ w3.T + b3
    assert out3.shape == (m3, h3)
    assert jnp.allclose(out3, ref3, atol=1e-4, rtol=1e-4)

    print("KERNEL_OK")
</pallas_src>

<mosaic_0001>
module attributes {stable_mosaic.version = 11 : i64} {
  func.func @_linear_bias_kernel(%arg0: i32, %arg1: i32, %arg2: i32, %arg3: memref<8x32xf32, #tpu.memory_space<vmem>>, %arg4: memref<32x32xf32, #tpu.memory_space<vmem>>, %arg5: memref<1x32xf32, #tpu.memory_space<vmem>>, %arg6: memref<8x32xf32, #tpu.memory_space<vmem>>) attributes {dimension_semantics = [#tpu.dimension_semantics<parallel>, #tpu.dimension_semantics<parallel>, #tpu.dimension_semantics<arbitrary>], iteration_bounds = array<i64: 1, 1, 1>, scalar_prefetch = 0 : i64, scratch_operands = 0 : i64, tpu.core_type = #tpu.core_type<tc>, window_params = [{transform_indices = @transform_0, window_bounds = array<i64: 8, 32>}, {transform_indices = @transform_1, window_bounds = array<i64: 32, 32>}, {transform_indices = @transform_2, window_bounds = array<i64: 1, 32>}, {transform_indices = @transform_3, window_bounds = array<i64: 8, 32>}]} {
    %c0 = arith.constant 0 : index
    %c0_0 = arith.constant 0 : index
    %0 = vector.load %arg3[%c0, %c0_0] : memref<8x32xf32, #tpu.memory_space<vmem>>, vector<8x32xf32>
    %c0_1 = arith.constant 0 : index
    %c0_2 = arith.constant 0 : index
    %1 = vector.load %arg4[%c0_1, %c0_2] : memref<32x32xf32, #tpu.memory_space<vmem>>, vector<32x32xf32>
    %cst = arith.constant dense<0.000000e+00> : vector<8x32xf32>
    %2 = tpu.matmul %0, %1, %cst {dimension_numbers = #tpu.dot_dimension_numbers<[1], [0], [0], [1], [0, 0, 1, 1], [], []>} : vector<8x32xf32>, vector<32x32xf32>, vector<8x32xf32> -> vector<8x32xf32>
    %c0_3 = arith.constant 0 : index
    %c0_4 = arith.constant 0 : index
    %3 = vector.load %arg5[%c0_3, %c0_4] : memref<1x32xf32, #tpu.memory_space<vmem>>, vector<1x32xf32>
    %4 = vector.broadcast %3 : vector<1x32xf32> to vector<8x32xf32>
    %5 = arith.addf %2, %4 : vector<8x32xf32>
    %c0_5 = arith.constant 0 : index
    %c0_6 = arith.constant 0 : index
    %6 = vector.load %arg6[%c0_5, %c0_6] : memref<8x32xf32, #tpu.memory_space<vmem>>, vector<8x32xf32>
    tpu.vector_store %arg6[%c0_5, %c0_6], %5 {strides = array<i32>} : memref<8x32xf32, #tpu.memory_space<vmem>>, vector<8x32xf32>,
    return
  }
  func.func @transform_0(%arg0: i32, %arg1: i32, %arg2: i32) -> (i32, i32) {
    %c0_i32 = arith.constant 0 : i32
    return %arg0, %arg2 : i32, i32
  }
  func.func @transform_1(%arg0: i32, %arg1: i32, %arg2: i32) -> (i32, i32) {
    %c0_i32 = arith.constant 0 : i32
    return %arg2, %arg1 : i32, i32
  }
  func.func @transform_2(%arg0: i32, %arg1: i32, %arg2: i32) -> (i32, i32) {
    %c0_i32 = arith.constant 0 : i32
    %c0_i32_0 = arith.constant 0 : i32
    return %c0_i32, %arg1 : i32, i32
  }
  func.func @transform_3(%arg0: i32, %arg1: i32, %arg2: i32) -> (i32, i32) {
    %c0_i32 = arith.constant 0 : i32
    return %arg0, %arg1 : i32, i32
  }
}

</mosaic_0001>

<bundles_post_ra>
// kernel: ic3net_msg_encoder.1
= control target key start
LH: loop header
LB: loop body
LE: loop exit
PB: predicated region body
PF: predicated region fallthrough
CT: control target
= control target key end

     0   :  { %v168_v3 = vmov 0.0|0.0   ;;  %vm169_vm0 = vmmov 0   ;;  %v170_v6 = vmov 0.0   ;;  %s222_s0 = inlined_call_operand.vmem [shape: f32[8,32], index: 0, kind: input, shape index: {}]   ;;  %s223_s1 = inlined_call_operand.vmem [shape: f32[32,32], index: 1, kind: input, shape index: {}]   ;;  %s224_s2 = inlined_call_operand.vmem [shape: f32[1,32], index: 2, kind: input, shape index: {}]   ;;  %s225_s3 = inlined_call_operand.hbm [shape: f32[8,32], index: 3, kind: output, shape index: {}]  }
   0x1   :  { %v16_v0 = vld [vmem:[%s223_s1] sm:$0xff]  ;;  %v17_v1 = vld [vmem:[%s223_s1 + $0x8] sm:$0xff]  ;;  %v18_v2 = vld [vmem:[%s223_s1 + $0x10] sm:$0xff]  ;;  %134 = vmatprep.subr.bf16.mxu0 %v168_v3  ;;  %131 = vmatprep.mubr.msk.f32.mxu0 %vm169_vm0, %v170_v6 }
   0x2   :  { %v135_v4 = vpack.c.bf16 %v17_v1, %v16_v0  ;;  %v19_v5 = vld [vmem:[%s223_s1 + $0x18] sm:$0xff] }
   0x3   :  { %8 = vsyncpa [#allocation3], 0  ;;  %v138_v7 = vpack.c.bf16 %v19_v5, %v18_v2  ;;  %v15_v8 = vld [vmem:[%s222_s0] sm:$0xff]  ;;  %vm27_vm1 = vcmask 261120   ;;  %s171_s24 = smov [#allocation2]  }
   0x4   :  { %136 = vmatpush3.bf16.msra.mxu0 %v135_v4  ;;  %v116_v9 = vld [vmem:[%s224_s2] ss:$0 sm:$0xff]  ;;  %s108_s1 = sshll.u32 %s171_s24, 4  ;;  %s109_s1 = int_to_ptr.vmem [resolvable:$true] %s108_s1 }
   0x5   :  { %137 = vmatprep.subr.bf16.mxu0 %v168_v3  ;;  %s144_s25 = scalar_lea.vmem %s109_s1, 128  ;;  %p149_p1 = scmp.lt.s32.totalorder %s109_s1, %s109_s1 }
   0x6   :  { %p145_p0 = scmp.ne.s32.totalorder %s109_s1, %s144_s25  ;;  %p150_p2 = scmp.lt.s32.totalorder %s144_s25, %s144_s25 }
   0x8   :  { %139 = vmatpush3.bf16.msra.mxu0 %v138_v7  ;;  %p151_p3 = por %p150_p2, %p149_p1 }
   0xa   :  { %p152_p4 = pnand %p151_p3, %p145_p0 }
   0xb   :  { %132 = vmatmul.mubr.msk.f32.vlgmr.msra.gmra.mrb[0].mxu0 %vm27_vm1, %v15_v8 }
  0xde   :  { %v97_v10 = vpop.f32.mrb[0].mxu0 }
  0xdf   :  { %v98_v11 = vadd.f32 %v116_v9, %v97_v10  ;;  %v133_v12 = vpop.f32.mrb[1].mxu0 }
  0xe1   :  { %101 = vst.msk [vmem:[#allocation2] sm:$0xff] %vm27_vm1, %v98_v11 }
  0xe2   :  { %155 = shalt.err (!%p152_p4)
}
  0xe3   :  { %s156_s27 = scalar_lea.hbm %s225_s3, 128 }
  0xe4   :  { %p157_p5 = scmp.ne.s32.totalorder %s225_s3, %s156_s27  ;;  %p160_p6 = scmp.lt.u32.totalorder %s156_s27, %s225_s3 }
  0xe6   :  { %p162_p7 = pnand %p160_p6, %p157_p5 }
  0xe8   :  { %165 = shalt.err (!%p162_p7)
}
  0xe9   :  { %111 = dma.vmem_to_hbm [thread:$0]  %s109_s1, 128, %s225_s3, [#allocation3]  }
  0xea   :  { %166 = dma.done.wait [#allocation3], 128  }
  0xeb   :  { %167 = vsyncadd [#allocation3], 4294967168 }
  0xec   :  { %115 = vsyncpa [#allocation3], 1 }

</bundles_post_ra>
